<compile_context>
chip_gen: v7x
topology: tpu7x:2x2x1
jax: 0.10.0
libtpu: 0.0.40
codegen_flags: <defaults>
</compile_context>

<pallas_src>
import functools
import math

import jax
import jax.numpy as jnp
from jax.experimental import pallas as pl
from jax.experimental.pallas import tpu as pltpu

_SIGMOID_MODES = ("SB", "SD", "ST")
_TANH_MODES = ("TD", "TT")
_RELU_TANH_MODES = ("TRB", "TRD", "TRT")

# Generation-safe VMEM sizing (v7x has only 64 MiB / TC; v5e scoped default is 16 MiB).
_VMEM_LIMIT_BYTES = 48 * 1024 * 1024     # scoped limit handed to Mosaic
_BLOCK_BYTE_BUDGET = 32 * 1024 * 1024    # all double-buffered streams must fit here
_TARGET_ROWS = 1024                      # >=512 sublane rows/block ~ 85% HBM roofline


def _normalise(x, mode):
    if mode in _SIGMOID_MODES:
        return jax.nn.sigmoid(x)
    if mode in _TANH_MODES:
        return jnp.tanh(x)
    if mode in _RELU_TANH_MODES:
        return jax.nn.relu(jnp.tanh(x))
    return x  # identity ('GS', 'D', 'T')


# ---------------- kernels (operate on a (BLOCK_B, T, N) block) ----------------

def _threshold_kernel(x_ref, o_ref, *, mode, threshold):
    # SurrGradSpike.forward == heaviside(input > 0)
    y = _normalise(x_ref[...].astype(jnp.float32), mode)
    o_ref[...] = (y - threshold > 0.0).astype(o_ref.dtype)


def _delta_kernel(x_ref, o_ref, *, mode, threshold):
    y = _normalise(x_ref[...].astype(jnp.float32), mode)         # (bb, T, N)
    if y.shape[1] > 1:
        # prev[t] = y[t-1], prev[0] = 0   (== F.pad(y, (0,0,1,0))[:, :-1])
        prev = jnp.concatenate([jnp.zeros_like(y[:, :1, :]), y[:, :-1, :]], axis=1)
    else:
        prev = jnp.zeros_like(y)
    o_ref[...] = (y - prev - threshold > 0.0).astype(o_ref.dtype)


def _bernoulli_kernel(x_ref, u_ref, o_ref, *, mode):
    # StochasticStraightThrough.forward == bernoulli(p)
    p = _normalise(x_ref[...].astype(jnp.float32), mode)
    o_ref[...] = (u_ref[...] < p).astype(o_ref.dtype)


def _gumbel_softmax_kernel(x_ref, u0_ref, u1_ref, o_ref):
    x = x_ref[...].astype(jnp.float32)
    g0 = -jnp.log(-jnp.log(u0_ref[...]))
    g1 = -jnp.log(-jnp.log(u1_ref[...]))
    # hard=True forward value:   softmax([a, b])[0] > 0.5  <=>  a > b
    # (tau > 0 scales both logits equally, so it cancels; exp/softmax removed.)
    o_ref[...] = ((x + g0) > (-x + g1)).astype(o_ref.dtype)


# ---------------- wrapper ----------------

def _pick_block_b(B, T, N, n_streams):
    """Largest useful batch-block given the VMEM double-buffer budget."""
    per_b_bytes = T * N * 4                               # account as f32 (conservative)
    cap = max(1, _BLOCK_BYTE_BUDGET // (2 * n_streams * per_b_bytes))
    want = max(1, -(-_TARGET_ROWS // T))                  # ceil(TARGET_ROWS / T)
    return int(min(B, cap, want))


def spiking_function(x, spike_mode, *, key=None, seed=0, tau=1.0,
                     threshold=None, block_b=None):
    """Pallas implementation of SpikingFunction(device, spike_mode).forward(x).

    x: (B, T, N) activations. Returns 0/1 spikes with dtype == x.dtype.
    """
    B, T, N = x.shape
    out_dtype = x.dtype
    del tau  # no effect on the hard forward output (scales both GS logits equally)

    if spike_mode in ("SB", "TRB"):
        kernel = functools.partial(_bernoulli_kernel, mode=spike_mode)
        if key is None:
            key = jax.random.PRNGKey(seed)
        rands = (jax.random.uniform(key, (B, T, N), dtype=jnp.float32),)
    elif spike_mode == "GS":
        kernel = _gumbel_softmax_kernel
        if key is None:
            key = jax.random.PRNGKey(seed)
        u = jax.random.uniform(key, (2, B, T, N), dtype=jnp.float32)
        rands = (u[0], u[1])
    elif spike_mode in ("D", "SD", "TD", "TRD"):
        # nn.Parameter(torch.tensor(0.01)) deterministic init
        thr = 0.01 if threshold is None else float(threshold)
        kernel = functools.partial(_delta_kernel, mode=spike_mode, threshold=thr)
        rands = ()
    elif spike_mode in ("T", "ST", "TT", "TRT"):
        if threshold is None:
            # nn.Parameter(self.normalise(torch.tensor(1.0))) deterministic init
            if spike_mode == "ST":
                threshold = 1.0 / (1.0 + math.exp(-1.0))       # sigmoid(1)
            elif spike_mode in ("TT", "TRT"):
                threshold = math.tanh(1.0)                     # tanh(1) (relu is no-op)
            else:
                threshold = 1.0                                # identity
        kernel = functools.partial(_threshold_kernel, mode=spike_mode,
                                   threshold=float(threshold))
        rands = ()
    else:
        raise ValueError(f"unsupported spike_mode: {spike_mode}")

    n_streams = 1 + len(rands) + 1                 # inputs + output, all (bb, T, N)
    bb = _pick_block_b(B, T, N, n_streams) if block_b is None else int(block_b)
    bb = max(1, min(bb, B))

    data_spec = pl.BlockSpec((bb, T, N), lambda b: (b, 0, 0))

    return pl.pallas_call(
        kernel,
        out_shape=jax.ShapeDtypeStruct((B, T, N), out_dtype),
        grid=(pl.cdiv(B, bb),),
        in_specs=[data_spec] * (1 + len(rands)),
        out_specs=data_spec,
        compiler_params=pltpu.CompilerParams(
            dimension_semantics=("parallel",),     # batch blocks are independent
            vmem_limit_bytes=_VMEM_LIMIT_BYTES,
        ),
    )(x, *rands)


if __name__ == "__main__":
    key = jax.random.PRNGKey(0)
    kx, kr = jax.random.split(key)
    B, T, N = 16, 8, 128  # (batch, time, neurons)
    x = jax.random.normal(kx, (B, T, N), dtype=jnp.float32)

    modes = ["SB", "SD", "ST", "TD", "TT", "TRB", "TRD", "TRT", "GS", "D", "T"]
    for m in modes:
        out = spiking_function(x, m, key=kr)
        out = jax.block_until_ready(out)
        assert out.shape == (B, T, N) and out.dtype == x.dtype
        # spikes must be binary
        assert bool(jnp.all((out == 0.0) | (out == 1.0)))

    # explicitly exercise a multi-block grid (grid=(4,)), deterministic + stochastic
    for m in ("SD", "GS"):
        out = jax.block_until_ready(spiking_function(x, m, key=kr, block_b=4))
        assert bool(jnp.all((out == 0.0) | (out == 1.0)))

    print("KERNEL_OK")
</pallas_src>

<mosaic_0001>
module attributes {stable_mosaic.version = 11 : i64} {
  func.func @_bernoulli_kernel(%arg0: i32, %arg1: memref<16x8x128xf32, #tpu.memory_space<vmem>>, %arg2: memref<16x8x128xf32, #tpu.memory_space<vmem>>, %arg3: memref<16x8x128xf32, #tpu.memory_space<vmem>>) attributes {dimension_semantics = [#tpu.dimension_semantics<parallel>], iteration_bounds = array<i64: 1>, scalar_prefetch = 0 : i64, scratch_operands = 0 : i64, tpu.core_type = #tpu.core_type<tc>, window_params = [{transform_indices = @transform_0, window_bounds = array<i64: 16, 8, 128>}, {transform_indices = @transform_1, window_bounds = array<i64: 16, 8, 128>}, {transform_indices = @transform_2, window_bounds = array<i64: 16, 8, 128>}]} {
    %c0 = arith.constant 0 : index
    %c0_0 = arith.constant 0 : index
    %c0_1 = arith.constant 0 : index
    %0 = vector.load %arg1[%c0, %c0_0, %c0_1] : memref<16x8x128xf32, #tpu.memory_space<vmem>>, vector<16x8x128xf32>
    %1 = arith.negf %0 : vector<16x8x128xf32>
    %2 = math.exp %1 : vector<16x8x128xf32>
    %cst = arith.constant 1.000000e+00 : f32
    %3 = vector.broadcast %cst : f32 to vector<16x8x128xf32>
    %4 = arith.addf %3, %2 : vector<16x8x128xf32>
    %5 = arith.divf %3, %4 : vector<16x8x128xf32>
    %c0_2 = arith.constant 0 : index
    %c0_3 = arith.constant 0 : index
    %c0_4 = arith.constant 0 : index
    %6 = vector.load %arg2[%c0_2, %c0_3, %c0_4] : memref<16x8x128xf32, #tpu.memory_space<vmem>>, vector<16x8x128xf32>
    %7 = arith.cmpf olt, %6, %5 : vector<16x8x128xf32>
    %8 = arith.extui %7 : vector<16x8x128xi1> to vector<16x8x128xi32>
    %9 = arith.sitofp %8 : vector<16x8x128xi32> to vector<16x8x128xf32>
    %c0_5 = arith.constant 0 : index
    %c0_6 = arith.constant 0 : index
    %c0_7 = arith.constant 0 : index
    %10 = vector.load %arg3[%c0_5, %c0_6, %c0_7] : memref<16x8x128xf32, #tpu.memory_space<vmem>>, vector<16x8x128xf32>
    tpu.vector_store %arg3[%c0_5, %c0_6, %c0_7], %9 {strides = array<i32>} : memref<16x8x128xf32, #tpu.memory_space<vmem>>, vector<16x8x128xf32>,
    return
  }
  func.func @transform_0(%arg0: i32) -> (i32, i32, i32) {
    %c0_i32 = arith.constant 0 : i32
    %c0_i32_0 = arith.constant 0 : i32
    %c0_i32_1 = arith.constant 0 : i32
    return %arg0, %c0_i32, %c0_i32_0 : i32, i32, i32
  }
  func.func @transform_1(%arg0: i32) -> (i32, i32, i32) {
    %c0_i32 = arith.constant 0 : i32
    %c0_i32_0 = arith.constant 0 : i32
    %c0_i32_1 = arith.constant 0 : i32
    return %arg0, %c0_i32, %c0_i32_0 : i32, i32, i32
  }
  func.func @transform_2(%arg0: i32) -> (i32, i32, i32) {
    %c0_i32 = arith.constant 0 : i32
    %c0_i32_0 = arith.constant 0 : i32
    %c0_i32_1 = arith.constant 0 : i32
    return %arg0, %c0_i32, %c0_i32_0 : i32, i32, i32
  }
}

</mosaic_0001>

<bundles_post_ra>
// kernel: tpu_custom_call.1
= control target key start
LH: loop header
LB: loop body
LE: loop exit
PB: predicated region body
PF: predicated region fallthrough
CT: control target
= control target key end

     0   :  { %7 = vsyncpa [#allocation3], 0  ;;  %s506_s0 = inlined_call_operand.hbm [shape: f32[16,8,128], index: 0, kind: input, shape index: {}]   ;;  %s507_s1 = inlined_call_operand.hbm [shape: f32[16,8,128], index: 1, kind: input, shape index: {}]   ;;  %s508_s2 = inlined_call_operand.hbm [shape: f32[16,8,128], index: 2, kind: output, shape index: {}]  }
   0x1   :  { %8 = vsyncpa [#allocation6], 0 }
   0x2   :  { %9 = vsyncpa [#allocation4], 0  ;;  %s424_s9 = smov [#allocation2]   ;;  %s352_s13 = scalar_lea.hbm %s506_s0, 2048 }
   0x3   :  { %s15_s10 = sshll.u32 %s424_s9, 4  ;;  %p353_p0 = scmp.ne.s32.totalorder %s506_s0, %s352_s13  ;;  %s16_s10 = int_to_ptr.vmem [resolvable:$true] %s15_s10 }
   0x4   :  { %p356_p1 = scmp.lt.u32.totalorder %s352_s13, %s506_s0 }
   0x6   :  { %p358_p2 = pnand %p356_p1, %p353_p0 }
   0x8   :  { %361 = shalt.err (!%p358_p2)
}
   0x9   :  { %s362_s18 = scalar_lea.vmem %s16_s10, 2048  ;;  %p367_p4 = scmp.lt.s32.totalorder %s16_s10, %s16_s10 }
   0xa   :  { %p363_p3 = scmp.ne.s32.totalorder %s16_s10, %s362_s18  ;;  %p368_p5 = scmp.lt.s32.totalorder %s362_s18, %s362_s18 }
   0xc   :  { %p369_p6 = por %p368_p5, %p367_p4 }
   0xe   :  { %p370_p7 = pnand %p369_p6, %p363_p3 }
  0x10   :  { %373 = shalt.err (!%p370_p7)
}
  0x11   :  { %s425_s19 = smov 128   ;;  %s426_s20 = smov 8  }
  0x12   :  { %21 = dma.hbm_to_vmem [thread:$0]  %s506_s0, 2048, %s16_s10, [#allocation3], %s425_s19, %s425_s19, %s426_s20  }
  0x13   :  { %s427_s23 = smov [#allocation5]   ;;  %s374_s27 = scalar_lea.hbm %s507_s1, 2048 }
  0x14   :  { %s27_s24 = sshll.u32 %s427_s23, 4  ;;  %p375_p8 = scmp.ne.s32.totalorder %s507_s1, %s374_s27  ;;  %s28_s24 = int_to_ptr.vmem [resolvable:$true] %s27_s24 }
  0x15   :  { %p378_p9 = scmp.lt.u32.totalorder %s374_s27, %s507_s1 }
  0x17   :  { %p380_p10 = pnand %p378_p9, %p375_p8 }
  0x19   :  { %383 = shalt.err (!%p380_p10)
}
  0x1a   :  { %s384_s4 = scalar_lea.vmem %s28_s24, 2048  ;;  %p389_p12 = scmp.lt.s32.totalorder %s28_s24, %s28_s24 }
  0x1b   :  { %p385_p11 = scmp.ne.s32.totalorder %s28_s24, %s384_s4  ;;  %p390_p13 = scmp.lt.s32.totalorder %s384_s4, %s384_s4 }
  0x1d   :  { %p391_p0 = por %p390_p13, %p389_p12 }
  0x1f   :  { %p392_p1 = pnand %p391_p0, %p385_p11 }
  0x21   :  { %395 = shalt.err (!%p392_p1)
}
  0x22   :  { %33 = dma.hbm_to_vmem [thread:$0]  %s507_s1, 2048, %s28_s24, [#allocation6], %s425_s19, %s425_s19, %s426_s20  }
  0x23   :  { %418 = dma.done.wait [#allocation3], 2048  }
  0x24   :  { %419 = vsyncadd [#allocation3], 4294965248 }
  0x25   :  { %420 = dma.done.wait [#allocation6], 2048  }
  0x26   :  { %421 = vsyncadd [#allocation6], 4294965248  ;;  %v40_v0 = vld [vmem:[#allocation2] sm:$0xff]  ;;  %v41_v1 = vld [vmem:[#allocation2 + $0x8] sm:$0xff]  ;;  %s429_s1 = smov [#allocation7]  }
  0x27   :  { %v250_v2 = vmul.f32 -1.442695, %v40_v0  ;;  %v251_v3 = vmul.f32 -1.442695, %v41_v1  ;;  %v42_v4 = vld [vmem:[#allocation2 + $0x10] sm:$0xff]  ;;  %v43_v6 = vld [vmem:[#allocation2 + $0x18] sm:$0xff] }
  0x28   :  { %v252_v5 = vmul.f32 -1.442695, %v42_v4  ;;  %v253_v7 = vmul.f32 -1.442695, %v43_v6  ;;  %v44_v8 = vld [vmem:[#allocation2 + $0x20] sm:$0xff]  ;;  %v45_v9 = vld [vmem:[#allocation2 + $0x28] sm:$0xff] }
  0x29   :  { %288 = vpow2.f32 %v250_v2  ;;  %v254_v10 = vmul.f32 -1.442695, %v44_v8  ;;  %v255_v11 = vmul.f32 -1.442695, %v45_v9  ;;  %v46_v12 = vld [vmem:[#allocation2 + $0x30] sm:$0xff]  ;;  %v47_v14 = vld [vmem:[#allocation2 + $0x38] sm:$0xff] }
  0x2a   :  { %290 = vpow2.f32 %v251_v3  ;;  %v256_v13 = vmul.f32 -1.442695, %v46_v12  ;;  %v257_v15 = vmul.f32 -1.442695, %v47_v14  ;;  %v48_v16 = vld [vmem:[#allocation2 + $0x40] sm:$0xff]  ;;  %v49_v17 = vld [vmem:[#allocation2 + $0x48] sm:$0xff] }
  0x2b   :  { %292 = vpow2.f32 %v252_v5  ;;  %v258_v18 = vmul.f32 -1.442695, %v48_v16  ;;  %v50_v19 = vld [vmem:[#allocation2 + $0x50] sm:$0xff]  ;;  %v259_v20 = vmul.f32 -1.442695, %v49_v17  ;;  %v51_v21 = vld [vmem:[#allocation2 + $0x58] sm:$0xff] }
  0x2c   :  { %294 = vpow2.f32 %v253_v7  ;;  %v260_v22 = vmul.f32 -1.442695, %v50_v19  ;;  %v52_v23 = vld [vmem:[#allocation2 + $0x60] sm:$0xff]  ;;  %v261_v24 = vmul.f32 -1.442695, %v51_v21  ;;  %v53_v45 = vld [vmem:[#allocation2 + $0x68] sm:$0xff] }
  0x2d   :  { %296 = vpow2.f32 %v254_v10  ;;  %v262_v25 = vmul.f32 -1.442695, %v52_v23  ;;  %v54_v48 = vld [vmem:[#allocation2 + $0x70] sm:$0xff]  ;;  %v152_v50 = vld [vmem:[#allocation5] sm:$0xff]  ;;  %v55_v52 = vld [vmem:[#allocation2 + $0x78] sm:$0xff]  ;;  %v428_v1 = vmov 0.0  }
  0x2e   :  { %298 = vpow2.f32 %v255_v11  ;;  %v153_v54 = vld [vmem:[#allocation5 + $0x8] sm:$0xff]  ;;  %v263_v56 = vmul.f32 -1.442695, %v53_v45  ;;  %v154_v58 = vld [vmem:[#allocation5 + $0x10] sm:$0xff]  ;;  %v264_v60 = vmul.f32 -1.442695, %v54_v48 }
  0x2f   :  { %300 = vpow2.f32 %v256_v13  ;;  %v155_v62 = vld [vmem:[#allocation5 + $0x18] sm:$0xff]  ;;  %v265_v63 = vmul.f32 -1.442695, %v55_v52  ;;  %v156_v3 = vld [vmem:[#allocation5 + $0x20] sm:$0xff]  ;;  %v157_v6 = vld [vmem:[#allocation5 + $0x28] sm:$0xff]  ;;  %s237_s6 = sshll.u32 %s429_s1, 4  ;;  %s238_s6 = int_to_ptr.vmem [resolvable:$true] %s237_s6 }
  0x30   :  { %302 = vpow2.f32 %v257_v15  ;;  %v158_v9 = vld [vmem:[#allocation5 + $0x30] sm:$0xff]  ;;  %v159_v12 = vld [vmem:[#allocation5 + $0x38] sm:$0xff]  ;;  %v160_v15 = vld [vmem:[#allocation5 + $0x40] sm:$0xff]  ;;  %s396_s7 = scalar_lea.vmem %s238_s6, 2048  ;;  %p401_p3 = scmp.lt.s32.totalorder %s238_s6, %s238_s6 }
  0x31   :  { %304 = vpow2.f32 %v258_v18  ;;  %v161_v18 = vld [vmem:[#allocation5 + $0x48] sm:$0xff]  ;;  %v162_v21 = vld [vmem:[#allocation5 + $0x50] sm:$0xff]  ;;  %p397_p2 = scmp.ne.s32.totalorder %s238_s6, %s396_s7  ;;  %p402_p4 = scmp.lt.s32.totalorder %s396_s7, %s396_s7 }
  0x32   :  { %306 = vpow2.f32 %v259_v20 }
  0x33   :  { %v289_v26 = vpop.eup %288  ;;  %308 = vpow2.f32 %v260_v22  ;;  %p403_p5 = por %p402_p4, %p401_p3 }
  0x34   :  { %v291_v27 = vpop.eup %290  ;;  %v104_v28 = vadd.f32 1.0, %v289_v26  ;;  %310 = vpow2.f32 %v261_v24  ;;  %v163_v24 = vld [vmem:[#allocation5 + $0x58] sm:$0xff] }
  0x35   :  { %v293_v29 = vpop.eup %292  ;;  %v105_v30 = vadd.f32 1.0, %v291_v27  ;;  %312 = vpow2.f32 %v262_v25  ;;  %v164_v27 = vld [vmem:[#allocation5 + $0x60] sm:$0xff]  ;;  %p404_p6 = pnand %p403_p5, %p397_p2 }
  0x36   :  { %v295_v31 = vpop.eup %294  ;;  %314 = vrcp.f32 %v104_v28  ;;  %v106_v32 = vadd.f32 1.0, %v293_v29 }
  0x37   :  { %v297_v33 = vpop.eup %296  ;;  %316 = vrcp.f32 %v105_v30  ;;  %v107_v34 = vadd.f32 1.0, %v295_v31 }
  0x38   :  { %v299_v35 = vpop.eup %298  ;;  %318 = vrcp.f32 %v106_v32  ;;  %v108_v36 = vadd.f32 1.0, %v297_v33 }
  0x39   :  { %v301_v37 = vpop.eup %300  ;;  %320 = vrcp.f32 %v107_v34  ;;  %v109_v38 = vadd.f32 1.0, %v299_v35 }
  0x3a   :  { %v303_v39 = vpop.eup %302  ;;  %322 = vrcp.f32 %v108_v36  ;;  %v110_v40 = vadd.f32 1.0, %v301_v37 }
  0x3b   :  { %v305_v41 = vpop.eup %304  ;;  %324 = vrcp.f32 %v109_v38  ;;  %v111_v42 = vadd.f32 1.0, %v303_v39 }
  0x3c   :  { %v307_v43 = vpop.eup %306  ;;  %326 = vrcp.f32 %v110_v40  ;;  %v112_v44 = vadd.f32 1.0, %v305_v41  ;;  %v165_v40 = vld [vmem:[#allocation5 + $0x68] sm:$0xff]  ;;  %v166_v41 = vld [vmem:[#allocation5 + $0x70] sm:$0xff] }
  0x3d   :  { %v309_v46 = vpop.eup %308  ;;  %328 = vrcp.f32 %v111_v42  ;;  %v113_v47 = vadd.f32 1.0, %v307_v43  ;;  %v167_v43 = vld [vmem:[#allocation5 + $0x78] sm:$0xff] }
  0x3e   :  { %v311_v49 = vpop.eup %310  ;;  %330 = vrcp.f32 %v112_v44  ;;  %v114_v51 = vadd.f32 1.0, %v309_v46 }
  0x3f   :  { %v313_v53 = vpop.eup %312  ;;  %332 = vrcp.f32 %v113_v47  ;;  %v115_v55 = vadd.f32 1.0, %v311_v49 }
  0x40   :  { %v315_v57 = vpop.eup %314  ;;  %334 = vrcp.f32 %v114_v51  ;;  %v116_v59 = vadd.f32 1.0, %v313_v53 }
  0x41   :  { %v317_v61 = vpop.eup %316  ;;  %vm168_vm0 = vcmp.lt.f32.partialorder %v152_v50, %v315_v57  ;;  %336 = vrcp.f32 %v115_v55 }
  0x42   :  { %v319_v0 = vpop.eup %318  ;;  %v266_v2 = vsel %vm168_vm0, 1.0, %v428_v1  ;;  %vm169_vm1 = vcmp.lt.f32.partialorder %v153_v54, %v317_v61  ;;  %338 = vrcp.f32 %v116_v59 }
  0x43   :  { %v321_v4 = vpop.eup %320  ;;  %216 = vst [vmem:[#allocation7] sm:$0xff] %v266_v2  ;;  %v267_v5 = vsel %vm169_vm1, 1.0, %v428_v1  ;;  %vm170_vm2 = vcmp.lt.f32.partialorder %v154_v58, %v319_v0  ;;  %340 = vpow2.f32 %v263_v56 }
  0x44   :  { %v323_v7 = vpop.eup %322  ;;  %217 = vst [vmem:[#allocation7 + $0x8] sm:$0xff] %v267_v5  ;;  %v268_v8 = vsel %vm170_vm2, 1.0, %v428_v1  ;;  %vm171_vm3 = vcmp.lt.f32.partialorder %v155_v62, %v321_v4  ;;  %342 = vpow2.f32 %v264_v60 }
  0x45   :  { %v325_v10 = vpop.eup %324  ;;  %218 = vst [vmem:[#allocation7 + $0x10] sm:$0xff] %v268_v8  ;;  %v269_v11 = vsel %vm171_vm3, 1.0, %v428_v1  ;;  %vm172_vm4 = vcmp.lt.f32.partialorder %v156_v3, %v323_v7  ;;  %344 = vpow2.f32 %v265_v63 }
  0x46   :  { %v327_v13 = vpop.eup %326  ;;  %219 = vst [vmem:[#allocation7 + $0x18] sm:$0xff] %v269_v11  ;;  %v270_v14 = vsel %vm172_vm4, 1.0, %v428_v1  ;;  %vm173_vm5 = vcmp.lt.f32.partialorder %v157_v6, %v325_v10 }
  0x47   :  { %v329_v16 = vpop.eup %328  ;;  %220 = vst [vmem:[#allocation7 + $0x20] sm:$0xff] %v270_v14  ;;  %v271_v17 = vsel %vm173_vm5, 1.0, %v428_v1  ;;  %vm174_vm6 = vcmp.lt.f32.partialorder %v158_v9, %v327_v13 }
  0x48   :  { %v331_v19 = vpop.eup %330  ;;  %221 = vst [vmem:[#allocation7 + $0x28] sm:$0xff] %v271_v17  ;;  %v272_v20 = vsel %vm174_vm6, 1.0, %v428_v1  ;;  %vm175_vm7 = vcmp.lt.f32.partialorder %v159_v12, %v329_v16 }
  0x49   :  { %v333_v22 = vpop.eup %332  ;;  %222 = vst [vmem:[#allocation7 + $0x30] sm:$0xff] %v272_v20  ;;  %v273_v23 = vsel %vm175_vm7, 1.0, %v428_v1  ;;  %vm176_vm8 = vcmp.lt.f32.partialorder %v160_v15, %v331_v19 }
  0x4a   :  { %v335_v25 = vpop.eup %334  ;;  %223 = vst [vmem:[#allocation7 + $0x38] sm:$0xff] %v273_v23  ;;  %v274_v26 = vsel %vm176_vm8, 1.0, %v428_v1  ;;  %vm177_vm9 = vcmp.lt.f32.partialorder %v161_v18, %v333_v22 }
  0x4b   :  { %v337_v28 = vpop.eup %336  ;;  %224 = vst [vmem:[#allocation7 + $0x40] sm:$0xff] %v274_v26  ;;  %v275_v29 = vsel %vm177_vm9, 1.0, %v428_v1  ;;  %vm178_vm10 = vcmp.lt.f32.partialorder %v162_v21, %v335_v25 }
  0x4c   :  { %v339_v30 = vpop.eup %338  ;;  %225 = vst [vmem:[#allocation7 + $0x48] sm:$0xff] %v275_v29  ;;  %v276_v31 = vsel %vm178_vm10, 1.0, %v428_v1  ;;  %vm179_vm11 = vcmp.lt.f32.partialorder %v163_v24, %v337_v28 }
  0x4d   :  { %v341_v32 = vpop.eup %340  ;;  %226 = vst [vmem:[#allocation7 + $0x50] sm:$0xff] %v276_v31  ;;  %v277_v33 = vsel %vm179_vm11, 1.0, %v428_v1  ;;  %vm180_vm12 = vcmp.lt.f32.partialorder %v164_v27, %v339_v30 }
  0x4e   :  { %v343_v34 = vpop.eup %342  ;;  %227 = vst [vmem:[#allocation7 + $0x58] sm:$0xff] %v277_v33  ;;  %v278_v35 = vsel %vm180_vm12, 1.0, %v428_v1  ;;  %v117_v36 = vadd.f32 1.0, %v341_v32 }
  0x4f   :  { %v345_v37 = vpop.eup %344  ;;  %228 = vst [vmem:[#allocation7 + $0x60] sm:$0xff] %v278_v35  ;;  %v118_v38 = vadd.f32 1.0, %v343_v34 }
  0x50   :  { %346 = vrcp.f32 %v117_v36  ;;  %v119_v39 = vadd.f32 1.0, %v345_v37 }
  0x51   :  { %348 = vrcp.f32 %v118_v38 }
  0x52   :  { %350 = vrcp.f32 %v119_v39 }
  0x5a   :  { %v347_v42 = vpop.eup %346 }
  0x5b   :  { %v349_v44 = vpop.eup %348  ;;  %vm181_vm13 = vcmp.lt.f32.partialorder %v165_v40, %v347_v42 }
  0x5c   :  { %v351_v45 = vpop.eup %350  ;;  %v279_v46 = vsel %vm181_vm13, 1.0, %v428_v1  ;;  %vm182_vm14 = vcmp.lt.f32.partialorder %v166_v41, %v349_v44 }
  0x5d   :  { %229 = vst [vmem:[#allocation7 + $0x68] sm:$0xff] %v279_v46  ;;  %v280_v47 = vsel %vm182_vm14, 1.0, %v428_v1  ;;  %vm183_vm15 = vcmp.lt.f32.partialorder %v167_v43, %v351_v45 }
  0x5e   :  { %230 = vst [vmem:[#allocation7 + $0x70] sm:$0xff] %v280_v47  ;;  %v281_v48 = vsel %vm183_vm15, 1.0, %v428_v1 }
  0x5f   :  { %231 = vst [vmem:[#allocation7 + $0x78] sm:$0xff] %v281_v48 }
  0x60   :  { %407 = shalt.err (!%p404_p6)
}
  0x61   :  { %s408_s10 = scalar_lea.hbm %s508_s2, 2048 }
  0x62   :  { %p409_p7 = scmp.ne.s32.totalorder %s508_s2, %s408_s10  ;;  %p412_p8 = scmp.lt.u32.totalorder %s408_s10, %s508_s2 }
  0x64   :  { %p414_p9 = pnand %p412_p8, %p409_p7 }
  0x66   :  { %417 = shalt.err (!%p414_p9)
}
  0x67   :  { %243 = dma.vmem_to_hbm [thread:$0]  %s238_s6, 2048, %s508_s2, [#allocation4], %s425_s19, %s425_s19, %s426_s20  }
  0x68   :  { %422 = dma.done.wait [#allocation4], 2048  }
  0x69   :  { %423 = vsyncadd [#allocation4], 4294965248 }
  0x6a   :  { %247 = vsyncpa [#allocation3], 1 }
  0x6b   :  { %248 = vsyncpa [#allocation6], 1 }
  0x6c   :  { %249 = vsyncpa [#allocation4], 1 }

</bundles_post_ra>
